<compile_context>
chip_gen: v7x
topology: tpu7x:2x2x1
jax: 0.10.0
libtpu: 0.0.40
codegen_flags: <defaults>
</compile_context>

<pallas_src>
import functools

import jax
import jax.numpy as jnp
from jax.experimental import pallas as pl
from jax.experimental.pallas import tpu as pltpu


def _round_up(x, m):
    return (x + m - 1) // m * m


def sam_kernel(ni_ref, no_ref, no_row_ref, eb_ref, qkv_ref, hsb_ref, out_ref,
               *, dp, head_dim):
    t = pl.program_id(0)

    # Zero the resident (n, dp) accumulator once.
    @pl.when(t == 0)
    def _():
        out_ref[...] = jnp.zeros_like(out_ref)

    tile_e = ni_ref.shape[0]
    n = qkv_ref.shape[0]

    # Per-tile one-hot gather matrices in bf16 (0/1 is exact).  Padded edges
    # use an out-of-range index == n -> all-zero rows -> zero contribution.
    iota_en = jax.lax.broadcasted_iota(jnp.int32, (tile_e, n), 1)
    oh_in = (iota_en == ni_ref[...]).astype(jnp.bfloat16)      # (tile_e, n)
    oh_out = (iota_en == no_ref[...]).astype(jnp.bfloat16)     # (tile_e, n)
    # Scatter one-hot built directly transposed so the final scatter-add is a
    # plain matmul (no XLU transpose of a (tile_e, n) operand).
    iota_ne = jax.lax.broadcasted_iota(jnp.int32, (n, tile_e), 0)
    oh_scat = (iota_ne == no_row_ref[0]).astype(jnp.bfloat16)  # (n, tile_e)

    # Fused Q/V gather: qkv slabs are ordered [Q, V, K], so one bf16 matmul
    # with a 256-lane output gathers both Q[node_in] and V[node_in].
    qv = jnp.dot(oh_in, qkv_ref[:, 0:2 * dp],
                 preferred_element_type=jnp.float32)           # (tile_e, 2*dp)
    qg = qv[:, 0:dp]
    vg = qv[:, dp:2 * dp]
    kg = jnp.dot(oh_out, qkv_ref[:, 2 * dp:3 * dp],
                 preferred_element_type=jnp.float32)           # (tile_e, dp)

    # Per-head score sum + head broadcast + attention scale folded into the
    # (dp, dp) head-block matrix (f32).  Pre-computed edge bias (head-summed,
    # head-broadcast, -1e30 in pad columns) added in f32.
    scores = jnp.dot(qg * kg, hsb_ref[...],
                     preferred_element_type=jnp.float32) + eb_ref[...]

    # Softmax over heads at full lane width: each real head value is repeated
    # head_dim times along lanes (hence the head_dim factor on the reciprocal);
    # pad columns carry -1e30 and vanish.
    m = jnp.max(scores, axis=-1, keepdims=True)
    p = jnp.exp(scores - m)
    denom = jnp.sum(p, axis=-1, keepdims=True)
    w = p * (pl.reciprocal(denom, approx=True) * float(head_dim))
    # TODO(synk): dropout on attention weights is identity here (eval mode).
    msg = (vg * w).astype(jnp.bfloat16)                        # (tile_e, dp)

    # Scatter-add over node_out: (n, tile_e) x (tile_e, dp) bf16 matmul with
    # f32 accumulation into the resident output.
    out_ref[...] += jnp.dot(oh_scat, msg, preferred_element_type=jnp.float32)


def sparse_attention_module(node_in, node_out, node_features, edge_features,
                            params, num_heads, *, tile_e=256):
    """SAM forward.  Weights stored transposed vs nn.Linear: w (in, out), b (1, out)."""
    n, _ = node_features.shape
    e, _ = edge_features.shape
    dout = params["wq"].shape[1]
    head_dim = dout // num_heads
    scale = float(head_dim) ** -0.5
    dp = _round_up(dout, 128)                       # lane-dense working width
    tile_e = max(8, _round_up(min(tile_e, _round_up(e, 8)), 8))
    e_pad = _round_up(e, tile_e)
    num_tiles = e_pad // tile_e

    # Head-block matrix: hsb[d, d'] = 1 iff d and d' belong to the same head.
    head_id = jnp.arange(dout) // head_dim
    hsb = (head_id[:, None] == head_id[None, :]).astype(jnp.float32)
    hsb_scaled = jnp.zeros((dp, dp), jnp.float32).at[:dout, :dout].set(hsb * scale)

    def pad_cols(a, width):
        out = jnp.zeros((a.shape[0], width), jnp.float32)
        return out.at[:, :a.shape[1]].set(a.astype(jnp.float32))

    # Dense QKV projection hoisted out of the kernel (plain XLA matmul).  Slab
    # order [Q, V, K] so Q and V share the node_in gather inside the kernel.
    wqvk = jnp.concatenate([pad_cols(params["wq"], dp),
                            pad_cols(params["wv"], dp),
                            pad_cols(params["wk"], dp)], axis=1)
    bqvk = jnp.concatenate([pad_cols(params["bq"], dp),
                            pad_cols(params["bv"], dp),
                            pad_cols(params["bk"], dp)], axis=1)
    x = node_features.astype(jnp.float32)
    qkv = (x @ wqvk + bqvk).astype(jnp.bfloat16)               # (n, 3*dp)

    # Edge bias precomputed on the host: head-summed + head-broadcast.  Pad
    # columns (and pad edge rows) carry -1e30 so they vanish under softmax.
    eb_real = (edge_features.astype(jnp.float32)
               @ (params["we"].astype(jnp.float32) @ hsb)
               + params["be"].astype(jnp.float32) @ hsb)       # (e, dout)
    eb = jnp.full((e_pad, dp), -1e30, jnp.float32).at[:e, :dout].set(eb_real)

    # Padded edges point at node index == n (out of range) -> zero one-hots.
    ni = jnp.full((e_pad, 1), n, jnp.int32).at[:e].set(node_in.astype(jnp.int32))
    no = jnp.full((e_pad, 1), n, jnp.int32).at[:e].set(node_out.astype(jnp.int32))
    # Row-layout copy of node_out for the transposed scatter one-hot
    # (3-D so every block dim equals the full array dim on the last axes).
    no_row = no.reshape(num_tiles, 1, tile_e)

    kernel = functools.partial(sam_kernel, dp=dp, head_dim=head_dim)

    out = pl.pallas_call(
        kernel,
        out_shape=jax.ShapeDtypeStruct((n, dp), jnp.float32),
        grid_spec=pltpu.PrefetchScalarGridSpec(
            num_scalar_prefetch=0,
            grid=(num_tiles,),
            in_specs=[
                pl.BlockSpec((tile_e, 1), lambda t: (t, 0)),        # node_in
                pl.BlockSpec((tile_e, 1), lambda t: (t, 0)),        # node_out
                pl.BlockSpec((1, 1, tile_e), lambda t: (t, 0, 0)),  # node_out (row)
                pl.BlockSpec((tile_e, dp), lambda t: (t, 0)),       # edge bias
                pl.BlockSpec((n, 3 * dp), lambda t: (0, 0)),        # qkv (resident)
                pl.BlockSpec((dp, dp), lambda t: (0, 0)),           # head blocks
            ],
            out_specs=pl.BlockSpec((n, dp), lambda t: (0, 0)),
        ),
        compiler_params=pltpu.CompilerParams(
            dimension_semantics=("arbitrary",)),
    )(ni, no, no_row, eb, qkv, hsb_scaled)

    return out[:, :dout]


def sam_reference(node_in, node_out, x, ef, params, num_heads):
    """Pure-JAX reference mirroring the PyTorch forward."""
    dout = params["wq"].shape[1]
    h = num_heads
    d = dout // h
    q = (x @ params["wq"] + params["bq"]).reshape(-1, h, d)
    k = (x @ params["wk"] + params["bk"]).reshape(-1, h, d)
    v = (x @ params["wv"] + params["bv"]).reshape(-1, h, d)
    eb = (ef @ params["we"] + params["be"]).reshape(-1, h, d)
    ni = node_in[:, 0]
    no = node_out[:, 0]
    scores = (q[ni] * k[no]).sum(-1) * (d ** -0.5) + eb.sum(-1)
    w = jax.nn.softmax(scores, axis=1)
    msg = v[ni] * w[..., None]
    upd = jax.ops.segment_sum(msg, no, num_segments=x.shape[0])
    return upd.reshape(-1, dout)


if __name__ == "__main__":
    num_nodes = 8
    num_edges = 16
    input_dim = 32
    output_dim = 32
    edge_dim = 16
    num_heads = 4

    key = jax.random.PRNGKey(0)
    ks = jax.random.split(key, 12)

    node_features = jax.random.normal(ks[0], (num_nodes, input_dim), jnp.float32)
    edge_features = jax.random.normal(ks[1], (num_edges, edge_dim), jnp.float32)
    node_in = jax.random.randint(ks[2], (num_edges, 1), 0, num_nodes, jnp.int32)
    node_out = jax.random.randint(ks[3], (num_edges, 1), 0, num_nodes, jnp.int32)

    def lin_init(kw, kb, fan_in, fan_out):
        bound = 1.0 / (fan_in ** 0.5)
        w = jax.random.uniform(kw, (fan_in, fan_out), jnp.float32, -bound, bound)
        b = jax.random.uniform(kb, (1, fan_out), jnp.float32, -bound, bound)
        return w, b

    wq, bq = lin_init(ks[4], ks[5], input_dim, output_dim)
    wk, bk = lin_init(ks[6], ks[7], input_dim, output_dim)
    wv, bv = lin_init(ks[8], ks[9], input_dim, output_dim)
    we, be = lin_init(ks[10], ks[11], edge_dim, output_dim)
    params = dict(wq=wq, bq=bq, wk=wk, bk=bk, wv=wv, bv=bv, we=we, be=be)

    # tile_e=8 -> 2 grid steps over the 16 edges (exercises the accumulator).
    out = sparse_attention_module(node_in, node_out, node_features,
                                  edge_features, params, num_heads, tile_e=8)
    out = jax.block_until_ready(out)

    ref = sam_reference(node_in, node_out, node_features, edge_features,
                        params, num_heads)
    assert out.shape == (num_nodes, output_dim)
    # bf16 gather/scatter path + approx reciprocal -> ~1e-3-level error.
    assert jnp.allclose(out, ref, atol=1e-2, rtol=1e-2), "mismatch vs reference"

    print("KERNEL_OK")
</pallas_src>

<mosaic_0001>
module attributes {stable_mosaic.version = 11 : i64} {
  func.func @sam_kernel(%arg0: i32, %arg1: memref<8x1xi32, #tpu.memory_space<vmem>>, %arg2: memref<8x1xi32, #tpu.memory_space<vmem>>, %arg3: memref<1x1x8xi32, #tpu.memory_space<vmem>>, %arg4: memref<8x128xf32, #tpu.memory_space<vmem>>, %arg5: memref<8x384xbf16, #tpu.memory_space<vmem>>, %arg6: memref<128x128xf32, #tpu.memory_space<vmem>>, %arg7: memref<8x128xf32, #tpu.memory_space<vmem>>) attributes {dimension_semantics = [#tpu.dimension_semantics<arbitrary>], iteration_bounds = array<i64: 2>, scalar_prefetch = 0 : i64, scratch_operands = 0 : i64, tpu.core_type = #tpu.core_type<tc>, window_params = [{transform_indices = @transform_0, window_bounds = array<i64: 8, 1>}, {transform_indices = @transform_1, window_bounds = array<i64: 8, 1>}, {transform_indices = @transform_2, window_bounds = array<i64: 1, 1, 8>}, {transform_indices = @transform_3, window_bounds = array<i64: 8, 128>}, {pipeline_mode = #tpu.pipeline_mode<synchronous>, transform_indices = @transform_4, window_bounds = array<i64: 8, 384>}, {pipeline_mode = #tpu.pipeline_mode<synchronous>, transform_indices = @transform_5, window_bounds = array<i64: 128, 128>}, {pipeline_mode = #tpu.pipeline_mode<synchronous>, transform_indices = @transform_6, window_bounds = array<i64: 8, 128>}]} {
    %c0_i32 = arith.constant 0 : i32
    %0 = arith.cmpi eq, %arg0, %c0_i32 : i32
    %1 = arith.extui %0 : i1 to i32
    %c0_i32_0 = arith.constant 0 : i32
    %2 = arith.cmpi ne, %1, %c0_i32_0 : i32
    scf.if %2 {
      %cst_24 = arith.constant 0.000000e+00 : f32
      %53 = vector.broadcast %cst_24 : f32 to vector<8x128xf32>
      %c0_25 = arith.constant 0 : index
      %c0_26 = arith.constant 0 : index
      %54 = vector.load %arg7[%c0_25, %c0_26] : memref<8x128xf32, #tpu.memory_space<vmem>>, vector<8x128xf32>
      tpu.vector_store %arg7[%c0_25, %c0_26], %53 {strides = array<i32>} : memref<8x128xf32, #tpu.memory_space<vmem>>, vector<8x128xf32>,
    } else {
    }
    %3 = tpu.iota {dimensions = array<i32: 1>} : vector<8x8xi32>
    %c0 = arith.constant 0 : index
    %c0_1 = arith.constant 0 : index
    %4 = vector.load %arg1[%c0, %c0_1] : memref<8x1xi32, #tpu.memory_space<vmem>>, vector<8x1xi32>
    %5 = vector.broadcast %4 : vector<8x1xi32> to vector<8x8xi32>
    %6 = arith.cmpi eq, %3, %5 : vector<8x8xi32>
    %7 = arith.extui %6 : vector<8x8xi1> to vector<8x8xi32>
    %8 = arith.sitofp %7 : vector<8x8xi32> to vector<8x8xf32>
    %9 = arith.truncf %8 : vector<8x8xf32> to vector<8x8xbf16>
    %c0_2 = arith.constant 0 : index
    %c0_3 = arith.constant 0 : index
    %10 = vector.load %arg2[%c0_2, %c0_3] : memref<8x1xi32, #tpu.memory_space<vmem>>, vector<8x1xi32>
    %11 = vector.broadcast %10 : vector<8x1xi32> to vector<8x8xi32>
    %12 = arith.cmpi eq, %3, %11 : vector<8x8xi32>
    %13 = arith.extui %12 : vector<8x8xi1> to vector<8x8xi32>
    %14 = arith.sitofp %13 : vector<8x8xi32> to vector<8x8xf32>
    %15 = arith.truncf %14 : vector<8x8xf32> to vector<8x8xbf16>
    %16 = tpu.iota {dimensions = array<i32: 0>} : vector<8x8xi32>
    %c0_4 = arith.constant 0 : index
    %c0_5 = arith.constant 0 : index
    %c0_6 = arith.constant 0 : index
    %17 = vector.load %arg3[%c0_4, %c0_5, %c0_6] : memref<1x1x8xi32, #tpu.memory_space<vmem>>, vector<1x1x8xi32>
    %18 = vector.shape_cast %17 : vector<1x1x8xi32> to vector<1x8xi32>
    %19 = vector.broadcast %18 : vector<1x8xi32> to vector<8x8xi32>
    %20 = arith.cmpi eq, %16, %19 : vector<8x8xi32>
    %21 = arith.extui %20 : vector<8x8xi1> to vector<8x8xi32>
    %22 = arith.sitofp %21 : vector<8x8xi32> to vector<8x8xf32>
    %23 = arith.truncf %22 : vector<8x8xf32> to vector<8x8xbf16>
    %c0_7 = arith.constant 0 : index
    %c0_8 = arith.constant 0 : index
    %24 = vector.load %arg5[%c0_7, %c0_8] : memref<8x384xbf16, #tpu.memory_space<vmem>>, vector<8x256xbf16>
    %cst = arith.constant dense<0.000000e+00> : vector<8x256xf32>
    %25 = tpu.matmul %9, %24, %cst {dimension_numbers = #tpu.dot_dimension_numbers<[1], [0], [0], [1], [0, 0, 1, 1], [], []>} : vector<8x8xbf16>, vector<8x256xbf16>, vector<8x256xf32> -> vector<8x256xf32>
    %26 = vector.extract_strided_slice %25 {offsets = [0, 0], sizes = [8, 128], strides = [1, 1]} : vector<8x256xf32> to vector<8x128xf32>
    %27 = vector.extract_strided_slice %25 {offsets = [0, 128], sizes = [8, 128], strides = [1, 1]} : vector<8x256xf32> to vector<8x128xf32>
    %c0_9 = arith.constant 0 : index
    %c256 = arith.constant 256 : index
    %28 = vector.load %arg5[%c0_9, %c256] : memref<8x384xbf16, #tpu.memory_space<vmem>>, vector<8x128xbf16>
    %cst_10 = arith.constant dense<0.000000e+00> : vector<8x128xf32>
    %29 = tpu.matmul %15, %28, %cst_10 {dimension_numbers = #tpu.dot_dimension_numbers<[1], [0], [0], [1], [0, 0, 1, 1], [], []>} : vector<8x8xbf16>, vector<8x128xbf16>, vector<8x128xf32> -> vector<8x128xf32>
    %30 = arith.mulf %26, %29 : vector<8x128xf32>
    %c0_11 = arith.constant 0 : index
    %c0_12 = arith.constant 0 : index
    %31 = vector.load %arg6[%c0_11, %c0_12] : memref<128x128xf32, #tpu.memory_space<vmem>>, vector<128x128xf32>
    %cst_13 = arith.constant dense<0.000000e+00> : vector<8x128xf32>
    %32 = tpu.matmul %30, %31, %cst_13 {dimension_numbers = #tpu.dot_dimension_numbers<[1], [0], [0], [1], [0, 0, 1, 1], [], []>} : vector<8x128xf32>, vector<128x128xf32>, vector<8x128xf32> -> vector<8x128xf32>
    %c0_14 = arith.constant 0 : index
    %c0_15 = arith.constant 0 : index
    %33 = vector.load %arg4[%c0_14, %c0_15] : memref<8x128xf32, #tpu.memory_space<vmem>>, vector<8x128xf32>
    %34 = arith.addf %32, %33 : vector<8x128xf32>
    %cst_16 = arith.constant dense<0xFF800000> : vector<8xf32>
    %35 = vector.multi_reduction <maximumf>, %34, %cst_16 [1] : vector<8x128xf32> to vector<8xf32>
    %36 = vector.shape_cast %35 : vector<8xf32> to vector<8x1xf32>
    %37 = vector.broadcast %36 : vector<8x1xf32> to vector<8x128xf32>
    %38 = arith.subf %34, %37 : vector<8x128xf32>
    %39 = math.exp %38 : vector<8x128xf32>
    %cst_17 = arith.constant dense<0.000000e+00> : vector<8xf32>
    %40 = vector.multi_reduction <add>, %39, %cst_17 [1] : vector<8x128xf32> to vector<8xf32>
    %41 = vector.shape_cast %40 : vector<8xf32> to vector<8x1xf32>
    %42 = tpu.reciprocal %41 {approx = true} : vector<8x1xf32> -> vector<8x1xf32>
    %cst_18 = arith.constant 8.000000e+00 : f32
    %43 = vector.broadcast %cst_18 : f32 to vector<8x1xf32>
    %44 = arith.mulf %42, %43 : vector<8x1xf32>
    %45 = vector.broadcast %44 : vector<8x1xf32> to vector<8x128xf32>
    %46 = arith.mulf %39, %45 : vector<8x128xf32>
    %47 = arith.mulf %27, %46 : vector<8x128xf32>
    %48 = arith.truncf %47 : vector<8x128xf32> to vector<8x128xbf16>
    %c0_19 = arith.constant 0 : index
    %c0_20 = arith.constant 0 : index
    %49 = vector.load %arg7[%c0_19, %c0_20] : memref<8x128xf32, #tpu.memory_space<vmem>>, vector<8x128xf32>
    %cst_21 = arith.constant dense<0.000000e+00> : vector<8x128xf32>
    %50 = tpu.matmul %23, %48, %cst_21 {dimension_numbers = #tpu.dot_dimension_numbers<[1], [0], [0], [1], [0, 0, 1, 1], [], []>} : vector<8x8xbf16>, vector<8x128xbf16>, vector<8x128xf32> -> vector<8x128xf32>
    %51 = arith.addf %49, %50 : vector<8x128xf32>
    %c0_22 = arith.constant 0 : index
    %c0_23 = arith.constant 0 : index
    %52 = vector.load %arg7[%c0_22, %c0_23] : memref<8x128xf32, #tpu.memory_space<vmem>>, vector<8x128xf32>
    tpu.vector_store %arg7[%c0_22, %c0_23], %51 {strides = array<i32>} : memref<8x128xf32, #tpu.memory_space<vmem>>, vector<8x128xf32>,
    return
  }
  func.func @transform_0(%arg0: i32) -> (i32, i32) {
    %c0_i32 = arith.constant 0 : i32
    %c0_i32_0 = arith.constant 0 : i32
    return %arg0, %c0_i32 : i32, i32
  }
  func.func @transform_1(%arg0: i32) -> (i32, i32) {
    %c0_i32 = arith.constant 0 : i32
    %c0_i32_0 = arith.constant 0 : i32
    return %arg0, %c0_i32 : i32, i32
  }
  func.func @transform_2(%arg0: i32) -> (i32, i32, i32) {
    %c0_i32 = arith.constant 0 : i32
    %c0_i32_0 = arith.constant 0 : i32
    %c0_i32_1 = arith.constant 0 : i32
    return %arg0, %c0_i32, %c0_i32_0 : i32, i32, i32
  }
  func.func @transform_3(%arg0: i32) -> (i32, i32) {
    %c0_i32 = arith.constant 0 : i32
    %c0_i32_0 = arith.constant 0 : i32
    return %arg0, %c0_i32 : i32, i32
  }
  func.func @transform_4(%arg0: i32) -> (i32, i32) {
    %c0_i32 = arith.constant 0 : i32
    %c0_i32_0 = arith.constant 0 : i32
    %c0_i32_1 = arith.constant 0 : i32
    return %c0_i32, %c0_i32_0 : i32, i32
  }
  func.func @transform_5(%arg0: i32) -> (i32, i32) {
    %c0_i32 = arith.constant 0 : i32
    %c0_i32_0 = arith.constant 0 : i32
    %c0_i32_1 = arith.constant 0 : i32
    return %c0_i32, %c0_i32_0 : i32, i32
  }
  func.func @transform_6(%arg0: i32) -> (i32, i32) {
    %c0_i32 = arith.constant 0 : i32
    %c0_i32_0 = arith.constant 0 : i32
    %c0_i32_1 = arith.constant 0 : i32
    return %c0_i32, %c0_i32_0 : i32, i32
  }
}

</mosaic_0001>

<bundles_post_ra>
// kernel: tpu_custom_call.1
= control target key start
LH: loop header
LB: loop body
LE: loop exit
PB: predicated region body
PF: predicated region fallthrough
CT: control target
= control target key end

     0   :  { %11 = vsyncpa [#allocation3], 0  ;;  %s1079_s0 = inlined_call_operand.vmem [shape: s32[16,1], index: 0, kind: input, shape index: {}]   ;;  %s1080_s1 = inlined_call_operand.vmem [shape: s32[16,1], index: 1, kind: input, shape index: {}]   ;;  %s1081_s2 = inlined_call_operand.vmem [shape: s32[2,1,8], index: 2, kind: input, shape index: {}]   ;;  %s1082_s3 = inlined_call_operand.vmem [shape: f32[16,128], index: 3, kind: input, shape index: {}]   ;;  %s1083_s4 = inlined_call_operand.vmem [shape: bf16[8,384], index: 4, kind: input, shape index: {}]   ;;  %s1084_s5 = inlined_call_operand.hbm [shape: f32[128,128], index: 5, kind: input, shape index: {}]   ;;  %s1085_s6 = inlined_call_operand.hbm [shape: f32[8,128], index: 6, kind: output, shape index: {}]  }
   0x1   :  { %12 = vsyncpa [#allocation4], 0  ;;  %s948_s21 = smov 0  }
   0x2 LB: > { %s954_s22 = sadd.s32 4294967295, %s902_s21   ;;  %p679_p0 = scmp.ge.s32.totalorder %s902_s21, 1  ;;  %s902_s21 = sphi %s948_s21, %s18_s21  }
   0x3   : > { %p190_p1 = scmp.lt.s32.totalorder %s902_s21, 3  ;;  %s904_s23 = smov [#allocation2]  }
   0x4   : > { %s205_s24 = sshll.u32 %s904_s23, 4  ;;  %p1086_p4 = scmp.eq.s32.totalorder %s954_s22, 0  ;;  %s206_s24 = int_to_ptr.vmem [resolvable:$true] %s205_s24 }
   0x5   : > { %p959_p3 = pnand %p679_p0, %p190_p1  ;;  %s834_s29 = scalar_lea.hbm %s1084_s5, 2048 }
   0x6   : > { %p835_p7 = scmp.ne.s32.totalorder %s1084_s5, %s834_s29  ;;  %p841_p11 = scmp.lt.u32.totalorder %s834_s29, %s1084_s5 }
   0x7   : > { %s1088_s25 = scalar_select %p959_p3, 1, 0 }
   0x8   : > { %p802_p5 = pneg %p959_p3 }
   0xa   : > { %p968_p6 = pnand %p1086_p4, %p802_p5 }
   0xc   : > { %p836_p8 = pneg %p968_p6 }
   0xe   : > { %p837_p9 = pnand %p836_p8, %p835_p7 }
  0x10   : > { %p838_p10 = pneg %p837_p9 }
  0x12   : > { %p843_p12 = pnand %p841_p11, %p838_p10 }
  0x14   : > { %846 = shalt.err (!%p843_p12)
}
  0x15   : > { %s847_s10 = scalar_lea.vmem %s206_s24, 2048  ;;  %p855_p5 = scmp.lt.s32.totalorder %s206_s24, %s206_s24 }
  0x16   : > { %p848_p13 = scmp.ne.s32.totalorder %s206_s24, %s847_s10  ;;  %p856_p2 = scmp.lt.s32.totalorder %s847_s10, %s847_s10 }
  0x18   : > { %p850_p0 = pnand %p848_p13, %p836_p8  ;;  %p857_p4 = por %p856_p2, %p855_p5 }
  0x1a   : > { %p851_p1 = pneg %p850_p0 }
  0x1c   : > { %p858_p3 = pnand %p857_p4, %p851_p1 }
  0x1e   : > { %861 = shalt.err (!%p858_p3)
}
  0x1f   : > { %s905_s11 = smov 128   ;;  %s906_s12 = smov 8  }
  0x20   : > { %805 = dma.hbm_to_vmem [thread:$0]  (!%p968_p6), %s1084_s5, 2048, %s206_s24, [#allocation3], %s905_s11, %s905_s11, %s906_s12  }
  0x21   : > { %p1090_p7 = scmp.ne.s32.totalorder %s1088_s25, 0 }
  0x22   : > { %p1091_p9 = scmp.eq.s32.totalorder (!%p1090_p7), %s954_s22, 0 }
  0x23   : > { %248 = sbr.rel (%p1090_p7) target bundleno = 1174 (0x496), region = 44 }
  0x2a   : > { %893 = dma.done.wait (%p1091_p9), [#allocation3], 2048   ;;  %p1092_p8 = pmov %p1091_p9 }
  0x2b   : > { %p283_p2 = scmp.lt.s32.totalorder %s954_s22, 1  ;;  %p1093_p3 = scmp.ne.s32.totalorder %s954_s22, 0 }
  0x2c   : > { %895 = vsyncadd (%p1092_p8), [#allocation3], 4294965248  ;;  %v907_v0 = vmov (!%p1093_p3), 0.0  }
  0x2d   : > { %s996_s15 = scalar_select %p283_p2, %s954_s22, 1 }
  0x2e   : > { %302 = sbr.rel (%p1093_p3) target bundleno = 53 (0x35), region = 52  ;;  %303 = vst [vmem:[#allocation5] sm:$0xff] (!%p1093_p3), %v907_v0 }
  0x2f   : > { %s999_s16 = sshll.u32 %s996_s15, 3  ;;  %s293_s19 = scalar_lea.vmem %s1081_s2, %s996_s15 }
  0x30   : > { %s286_s24 = scalar_lea.vmem %s1079_s0, %s999_s16  ;;  %s290_s27 = scalar_lea.vmem %s1080_s1, %s999_s16 }
  0x31   : > { %s297_s30 = scalar_lea.vmem %s1082_s3, %s999_s16 }
  0x35 PF: > { %v306_v1 = vld [vmem:[%s286_s24] sm:$0xff]  ;;  %v908_v2 = vmov 0   ;;  %vm343_vm0 = vcmask 1043456   ;;  %v909_v8 = vmov 0.0   ;;  %vm910_vm1 = vmmov 0   ;;  %v440_v10 = vld [vmem:[#allocation2 + $0x8] sm:$0xff] }
  0x36   : > { %827 = vset.pattern.permute.xlu0 %v908_v2  ;;  %v333_v3 = vld [vmem:[%s1083_s4] sm:$0xff]  ;;  %382 = vmatprep.mubr.bf16.mxu1 %v908_v2  ;;  %v441_v11 = vld [vmem:[#allocation2 + $0x10] sm:$0xff]  ;;  %v911_v12 = vmov 0.0|0.0   ;;  %v442_v14 = vld [vmem:[#allocation2 + $0x18] sm:$0xff]  ;;  %v304_v25 = vlaneseq  ;;  %vm339_vm3 = vcmask 64512   ;;  %s912_s16 = smov [#allocation5]  }
  0x37   : > { %308 = vperm.xlu0 %827, %v306_v1   ;;  %v693_v4 = vcombine.high %v333_v3, %v333_v3  ;;  %v692_v5 = vcombine.low %v333_v3, %v333_v3  ;;  %v314_v6 = vld [vmem:[%s290_s27] sm:$0xff]  ;;  %761 = vmatprep.mubr.msk.f32.mxu0 %vm910_vm1, %v909_v8  ;;  %v774_v15 = vpack.c.bf16 %v442_v14, %v441_v11  ;;  %v444_v17 = vld [vmem:[#allocation2 + $0x28] sm:$0xff]  ;;  %v445_v19 = vld [vmem:[#allocation2 + $0x30] sm:$0xff]  ;;  %s594_s17 = sshll.u32 %s912_s16, 4  ;;  %p808_p4 = scmp.eq.s32.totalorder %s954_s22, 1  ;;  %s595_s17 = int_to_ptr.vmem [resolvable:$true] %s594_s17 }
  0x38   : > { %v439_v9 = vld [vmem:[#allocation2] sm:$0xff]  ;;  %770 = vmatprep.subr.bf16.mxu0 %v911_v12  ;;  %v446_v20 = vld [vmem:[#allocation2 + $0x38] sm:$0xff]  ;;  %v448_v23 = vld [vmem:[#allocation2 + $0x48] sm:$0xff]  ;;  %v305_v26 = vand.u32 127, %v304_v25  ;;  %v323_v62 = vshrl.u32 %v304_v25, 7  ;;  %s862_s15 = scalar_lea.vmem %s595_s17, 128  ;;  %p869_p12 = scmp.lt.s32.totalorder %s595_s17, %s595_s17 }
  0x39   : > { %694 = vmatprep.subr.msk.bf16.mxu1 %vm343_vm0, %v693_v4  ;;  %v345_v7 = vsel %vm343_vm0, %v692_v5, 0  ;;  %v771_v13 = vpack.c.bf16 %v440_v10, %v439_v9  ;;  %v443_v16 = vld [vmem:[#allocation2 + $0x20] sm:$0xff]  ;;  %v780_v21 = vpack.c.bf16 %v446_v20, %v445_v19  ;;  %v391_v28 = vld [vmem:[%s1083_s4 + $0x8] sm:$0xf]  ;;  %v449_v35 = vld [vmem:[#allocation2 + $0x50] sm:$0xff]  ;;  %p863_p6 = scmp.ne.s32.totalorder %s595_s17, %s862_s15  ;;  %p870_p13 = scmp.lt.s32.totalorder %s862_s15, %s862_s15 }
  0x3a   : > { %351 = vmatpush1.bf16.msra.mxu1 %v345_v7  ;;  %v777_v18 = vpack.c.bf16 %v444_v17, %v443_v16  ;;  %v447_v22 = vld [vmem:[#allocation2 + $0x40] sm:$0xff]  ;;  %v396_v31 = vsel %vm343_vm0, %v391_v28, 0  ;;  %v450_v36 = vld [vmem:[#allocation2 + $0x58] sm:$0xff]  ;;  %v452_v39 = vld [vmem:[#allocation2 + $0x68] sm:$0xff] }
  0x3b   : > { %316 = vperm.xlu0 %827, %v314_v6   ;;  %723 = vmatprep.subr.bf16.mxu1 %v909_v8  ;;  %v783_v24 = vpack.c.bf16 %v448_v23, %v447_v22  ;;  %v786_v37 = vpack.c.bf16 %v450_v36, %v449_v35  ;;  %v451_v38 = vld [vmem:[#allocation2 + $0x60] sm:$0xff]  ;;  %v453_v41 = vld [vmem:[#allocation2 + $0x70] sm:$0xff]  ;;  %v454_v42 = vld [vmem:[#allocation2 + $0x78] sm:$0xff]  ;;  %p864_p10 = pnand %p863_p6, %p808_p4  ;;  %p871_p0 = por %p870_p13, %p869_p12 }
  0x3c   : > { %772 = vmatpush3.bf16.msra.mxu0 %v771_v13  ;;  %v789_v40 = vpack.c.bf16 %v452_v39, %v451_v38  ;;  %v792_v43 = vpack.c.bf16 %v454_v42, %v453_v41  ;;  %v455_v53 = vld [vmem:[%s297_s30] sm:$0xff] }
  0x3d   : > { %773 = vmatprep.subr.bf16.mxu0 %v911_v12  ;;  %v690_v0 = vld [vmem:[%s293_s19] ss:$0 sm:$0xff]  ;;  %p865_p11 = pneg %p864_p10 }
  0x3e   : > { %vm329_vm5 = vcmp.eq.s32.totalorder %v323_v62, %v690_v0  ;;  %v538_v9 = vld [vmem:[#allocation5] sm:$0xff] }
  0x3f   : > { %v691_v4 = vsel %vm329_vm5, 1.0, %v909_v8  ;;  %p872_p1 = pnand %p871_p0, %p865_p11 }
  0x40   : > { %775 = vmatpush3.bf16.msra.mxu0 %v774_v15  ;;  %v332_v6 = vpack.c.bf16 %v691_v4, %v691_v4 }
  0x41   : > { %776 = vmatprep.subr.bf16.mxu0 %v911_v12 }
  0x44   : > { %778 = vmatpush3.bf16.msra.mxu0 %v777_v18 }
  0x45   : > { %779 = vmatprep.subr.bf16.mxu0 %v911_v12 }
  0x48   : > { %781 = vmatpush3.bf16.msra.mxu0 %v780_v21 }
  0x49   : > { %782 = vmatprep.subr.bf16.mxu0 %v911_v12 }
  0x4c   : > { %784 = vmatpush3.bf16.msra.mxu0 %v783_v24 }
  0x4d   : > { %785 = vmatprep.subr.bf16.mxu0 %v911_v12 }
  0x50   : > { %787 = vmatpush3.bf16.msra.mxu0 %v786_v37 }
  0x51   : > { %788 = vmatprep.subr.bf16.mxu0 %v911_v12 }
  0x54   : > { %790 = vmatpush3.bf16.msra.mxu0 %v789_v40 }
  0x55   : > { %791 = vmatprep.subr.bf16.mxu0 %v911_v12 }
  0x58   : > { %793 = vmatpush3.bf16.msra.mxu0 %v792_v43 }
  0xb6   : > { %v309_v27 = vpop.permute.xlu0 %308 }
  0xb7   : > { %vm310_vm2 = vcmp.eq.s32.totalorder %v305_v26, %v309_v27 }
  0xb8   : > { %v688_v29 = vsel %vm310_vm2, 1.0, %v909_v8 }
  0xb9   : > { %v313_v30 = vpack.c.bf16 %v688_v29, %v688_v29 }
  0xba   : > { %v317_v32 = vpop.permute.xlu0 %316 }
  0xbb   : > { %vm318_vm4 = vcmp.eq.s32.totalorder %v305_v26, %v317_v32  ;;  %695 = vmatmul.mubr.msk.bf16.vlgmr.msra.gmra.mrb[0].mxu1 %vm339_vm3, %v313_v30 }
  0xbc   : > { %724 = vmatpush3.bf16.msra.mxu1 %v396_v31  ;;  %725 = vmatprep.mubr.msk.bf16.mxu1 %vm910_vm1, %v909_v8  ;;  %v689_v33 = vsel %vm318_vm4, 1.0, %v909_v8 }
  0xbd   : > { %764 = vmatprep.subr.bf16.mxu1 %v909_v8  ;;  %v321_v34 = vpack.c.bf16 %v689_v33, %v689_v33 }
  0xc3   : > { %726 = vmatmul.mubr.msk.bf16.vlgmr.msra.gmra.mrb[4].mxu1 %vm339_vm3, %v321_v34 }
  0xc4   : > { %766 = vmatprep.mubr.msk.bf16.mxu1 %vm910_vm1, %v909_v8 }
 0x18e   : > { %v384_v44 = vpop.f32.mrb[0].mxu1 }
 0x18f   : > { %v386_v45 = vpop.f32.mrb[1].mxu1 }
 0x190   : > { %v388_v46 = vpop.f32.mrb[2].mxu1 }
 0x191   : > { %v389_v47 = vpop.f32.mrb[3].mxu1 }
 0x196   : > { %v432_v48 = vpop.f32.mrb[4].mxu1 }
 0x197   : > { %v438_v49 = vmul.f32 %v432_v48, %v384_v44  ;;  %v727_v50 = vpop.f32.mrb[5].mxu1 }
 0x198   : > { %v435_v51 = vpop.f32.mrb[6].mxu1 }
 0x199   : > { %v728_v52 = vpop.f32.mrb[7].mxu1  ;;  %762 = vmatmul.mubr.f32.vlgmr.msra.gmra.mrb[0].mxu0 %v438_v49 }
 0x26c   : > { %v522_v54 = vpop.f32.mrb[0].mxu0 }
 0x26d   : > { %v523_v55 = vadd.f32 %v522_v54, %v455_v53  ;;  %v763_v56 = vpop.f32.mrb[1].mxu0 }
 0x26f   : > { %526 = vmax.xlane.f32.xlu1 %v523_v55 }
 0x2fc   : > { %v527_v57 = vpop.xlane.xlu1 %526 }
 0x2fd   : > { %v528_v58 = vsub.f32 %v523_v55, %v527_v57 }
 0x2ff   : > { %v529_v59 = vmul.f32 1.442695, %v528_v58 }
 0x301   : > { %830 = vpow2.f32 %v529_v59 }
 0x30b   : > { %v831_v60 = vpop.eup %830 }
 0x30c   : > { %531 = vadd.xlane.f32.xlu1 %v831_v60 }
 0x399   : > { %v532_v61 = vpop.xlane.xlu1 %531 }
 0x39a   : > { %832 = vrcp.f32 %v532_v61 }
 0x3a4   : > { %v833_v63 = vpop.eup %832 }
 0x3a5   : > { %v534_v1 = vmul.f32 8.0, %v833_v63 }
 0x3a7   : > { %v535_v2 = vmul.f32 %v831_v60, %v534_v1 }
 0x3a9   : > { %v536_v3 = vmul.f32 %v535_v2, %v386_v45 }
 0x3ab   : > { %v537_v5 = vpack.c.bf16 %v536_v3, %v536_v3 }
 0x3ad   : > { %v543_v7 = vsel %vm343_vm0, %v537_v5, 0 }
 0x3ae   : > { %765 = vmatpush3.bf16.msra.mxu1 %v543_v7 }
 0x3b1   : > { %767 = vmatmul.mubr.msk.bf16.vlgmr.msra.gmra.mrb[8].mxu1 %vm339_vm3, %v332_v6 }
 0x484   : > { %v579_v10 = vpop.f32.mrb[8].mxu1 }
 0x485   : > { %v585_v11 = vadd.f32 %v579_v10, %v538_v9  ;;  %v768_v12 = vpop.f32.mrb[9].mxu1 }
 0x486   : > { %v582_v13 = vpop.f32.mrb[10].mxu1 }
 0x487   : > { %586 = vst [vmem:[#allocation5] sm:$0xff] %v585_v11  ;;  %v769_v14 = vpop.f32.mrb[11].mxu1 }
 0x488   : > { %875 = shalt.err (!%p872_p1)
}
 0x489   : > { %s876_s20 = scalar_lea.hbm %s1085_s6, 128 }
 0x48a   : > { %p877_p5 = scmp.ne.s32.totalorder %s1085_s6, %s876_s20  ;;  %p882_p8 = scmp.lt.u32.totalorder %s876_s20, %s1085_s6 }
 0x48c   : > { %p878_p7 = pnand %p877_p5, %p808_p4 }
 0x48e   : > { %p879_p9 = pneg %p878_p7 }
 0x490   : > { %p884_p2 = pnand %p882_p8, %p879_p9 }
 0x492   : > { %887 = shalt.err (!%p884_p2)
}
 0x493   : > { %799 = dma.vmem_to_hbm [thread:$0]  (%p808_p4), %s595_s17, 128, %s1085_s6, [#allocation4]  }
 0x494   : > { %897 = dma.done.wait (%p808_p4), [#allocation4], 128  }
 0x495   : > { %899 = vsyncadd (%p808_p4), [#allocation4], 4294967168 }
 0x496 PF: > { %s18_s21 = sadd.s32 1, %s902_s21  }
 0x497   : > { %p15_p3 = scmp.ge.s32.totalorder %s18_s21, 4  }
 0x499   :  { %17 = sbr.rel (!%p15_p3) target bundleno = 2 (0x2), region = 89 }
 0x4a0   :  { %607 = vsyncpa [#allocation3], 1 }
 0x4a1   :  { %609 = vsyncpa [#allocation3 + $0x1], 1 }
 0x4a2   :  { %610 = vsyncpa [#allocation4], 1 }
 0x4a3   :  { %612 = vsyncpa [#allocation4 + $0x1], 1 }

</bundles_post_ra>
